<compile_context>
chip_gen: v7x
topology: tpu7x:2x2x1
jax: 0.10.0
libtpu: 0.0.40
codegen_flags: <defaults>
</compile_context>

<pallas_src>
import jax
import jax.numpy as jnp
from jax.experimental import pallas as pl
from jax.experimental.pallas import tpu as pltpu


def gcn3_kernel(adj_ref, x_ref,
                w1_ref, b1_ref,
                w2_ref, b2_ref,
                w3_ref, b3_ref,
                wc_ref, bc_ref,
                out_ref):
    # ---- fused GraphConv(norm='both') normalization on the raw adjacency ----
    adj = adj_ref[0].astype(jnp.float32)                            # [N, N], A[dst, src]
    deg_in = jnp.maximum(jnp.sum(adj, axis=1, keepdims=True), 1.0)  # [N, 1] in-degree(dst)
    deg_out = jnp.maximum(jnp.sum(adj, axis=0, keepdims=True), 1.0)  # [1, N] out-degree(src)
    a_hat = (adj * jax.lax.rsqrt(deg_in) * jax.lax.rsqrt(deg_out)).astype(jnp.bfloat16)

    def graph_conv_relu(h, w_ref, b_ref):
        # right-multiply first (feature-dim contraction), then aggregate: A_hat @ (H @ W)
        hw = jnp.dot(h, w_ref[...], preferred_element_type=jnp.float32).astype(jnp.bfloat16)
        z = jnp.dot(a_hat, hw, preferred_element_type=jnp.float32) + b_ref[...]
        return jnp.maximum(z, 0.0).astype(jnp.bfloat16)

    h = x_ref[0].astype(jnp.bfloat16)                               # [N, F]
    h = graph_conv_relu(h, w1_ref, b1_ref)                          # [N, Hp]
    h = graph_conv_relu(h, w2_ref, b2_ref)                          # [N, Hp]
    h = graph_conv_relu(h, w3_ref, b3_ref)                          # [N, Hp]

    # dgl.mean_nodes as an MXU matmul: (1/N) * ones[1,N] @ H3
    n = h.shape[0]
    mean_vec = jnp.full((1, n), 1.0 / n, dtype=jnp.bfloat16)
    g = jnp.dot(mean_vec, h, preferred_element_type=jnp.float32)    # [1, Hp]

    # F.dropout(training=False) is identity (eval mode).
    logit = jnp.dot(g.astype(jnp.bfloat16), wc_ref[...],
                    preferred_element_type=jnp.float32) + bc_ref[...]  # [1, 1]
    out_ref[0] = jax.nn.sigmoid(logit)


def _pad_axis(a, axis, target):
    pad = target - a.shape[axis]
    if pad <= 0:
        return a
    widths = [(0, 0)] * a.ndim
    widths[axis] = (0, pad)
    return jnp.pad(a, widths)


def gcn3_forward(adj, x, params):
    """adj: [B, N, N] raw 0/1 adjacency (A[dst, src]); x: [B, N, F] node features."""
    w1, b1, w2, b2, w3, b3, wc, bc = params
    B, N, F_ = x.shape
    H = w1.shape[1]
    Hp = ((H + 127) // 128) * 128  # pad hidden dim to full lane width

    # dtype / padding policy: bf16 MXU operands, f32 biases; zero-padded hidden lanes.
    adj_in = adj.astype(jnp.bfloat16)
    x_in = x.astype(jnp.bfloat16)
    w1p = _pad_axis(w1, 1, Hp).astype(jnp.bfloat16)
    b1p = _pad_axis(b1.reshape(1, -1), 1, Hp).astype(jnp.float32)
    w2p = _pad_axis(_pad_axis(w2, 0, Hp), 1, Hp).astype(jnp.bfloat16)
    b2p = _pad_axis(b2.reshape(1, -1), 1, Hp).astype(jnp.float32)
    w3p = _pad_axis(_pad_axis(w3, 0, Hp), 1, Hp).astype(jnp.bfloat16)
    b3p = _pad_axis(b3.reshape(1, -1), 1, Hp).astype(jnp.float32)
    wcp = _pad_axis(wc, 0, Hp).astype(jnp.bfloat16)
    bcp = bc.reshape(1, 1).astype(jnp.float32)

    per_graph = lambda b: (b, 0, 0)
    shared2d = lambda b: (0, 0)

    out = pl.pallas_call(
        gcn3_kernel,
        out_shape=jax.ShapeDtypeStruct((B, 1, 1), jnp.float32),
        grid=(B,),
        in_specs=[
            pl.BlockSpec((1, N, N), per_graph),      # adjacency (per graph)
            pl.BlockSpec((1, N, F_), per_graph),     # node features (per graph)
            pl.BlockSpec((F_, Hp), shared2d),        # W1
            pl.BlockSpec((1, Hp), shared2d),         # b1
            pl.BlockSpec((Hp, Hp), shared2d),        # W2
            pl.BlockSpec((1, Hp), shared2d),         # b2
            pl.BlockSpec((Hp, Hp), shared2d),        # W3
            pl.BlockSpec((1, Hp), shared2d),         # b3
            pl.BlockSpec((Hp, 1), shared2d),         # Wc
            pl.BlockSpec((1, 1), shared2d),          # bc
        ],
        out_specs=pl.BlockSpec((1, 1, 1), per_graph),
        compiler_params=pltpu.CompilerParams(
            dimension_semantics=("parallel",)),      # v7x: shard batch over 2 TCs
    )(adj_in, x_in, w1p, b1p, w2p, b2p, w3p, b3p, wcp, bcp)

    return out.reshape(B, 1)


if __name__ == "__main__":
    key = jax.random.PRNGKey(0)
    (k_adj, k_x, k_w1, k_b1, k_w2, k_b2, k_w3, k_b3, k_wc, k_bc) = jax.random.split(key, 10)

    B = 8             # graphs per batch (grid axis)
    N = 16            # nodes per graph
    num_features = 8
    hidden_dim = 32

    # Random undirected graphs without self-loops, dense adjacency A[dst, src].
    upper = (jax.random.uniform(k_adj, (B, N, N)) < 0.3).astype(jnp.float32)
    tri = jnp.triu(upper, k=1)
    adj = tri + jnp.swapaxes(tri, 1, 2)

    # Node features.
    x = jax.random.normal(k_x, (B, N, num_features), dtype=jnp.float32)

    def glorot(k, shape):
        fan_in, fan_out = shape
        lim = (6.0 / (fan_in + fan_out)) ** 0.5
        return jax.random.uniform(k, shape, minval=-lim, maxval=lim, dtype=jnp.float32)

    w1 = glorot(k_w1, (num_features, hidden_dim))
    b1 = jnp.full((hidden_dim,), 0.01, jnp.float32)
    w2 = glorot(k_w2, (hidden_dim, hidden_dim))
    b2 = jnp.full((hidden_dim,), 0.01, jnp.float32)
    w3 = glorot(k_w3, (hidden_dim, hidden_dim))
    b3 = jnp.full((hidden_dim,), 0.01, jnp.float32)
    wc = glorot(k_wc, (hidden_dim, 1))
    bc = jnp.zeros((1,), jnp.float32)

    params = (w1, b1, w2, b2, w3, b3, wc, bc)

    out = gcn3_forward(adj, x, params)
    out = jax.block_until_ready(out)

    # Pure-JAX f32 reference (GraphConv norm='both', degrees clamped to >= 1).
    def ref_forward(adj, x):
        deg_in = jnp.maximum(jnp.sum(adj, axis=2, keepdims=True), 1.0)   # [B, N, 1]
        deg_out = jnp.maximum(jnp.sum(adj, axis=1, keepdims=True), 1.0)  # [B, 1, N]
        a_hat = adj * (deg_in ** -0.5) * (deg_out ** -0.5)
        h = jnp.maximum(jnp.einsum('bij,bjk->bik', a_hat, x @ w1) + b1, 0.0)
        h = jnp.maximum(jnp.einsum('bij,bjk->bik', a_hat, h @ w2) + b2, 0.0)
        h = jnp.maximum(jnp.einsum('bij,bjk->bik', a_hat, h @ w3) + b3, 0.0)
        g = jnp.mean(h, axis=1)                                           # [B, H]
        return jax.nn.sigmoid(g @ wc + bc)                                # [B, 1]

    expected = ref_forward(adj, x)
    assert out.shape == (B, 1), out.shape
    # bf16 operands in the kernel vs f32 reference -> modest tolerance.
    assert jnp.allclose(out, expected, atol=2e-2, rtol=2e-2), (out, expected)

    print("KERNEL_OK")
</pallas_src>

<mosaic_0001>
module attributes {stable_mosaic.version = 11 : i64} {
  func.func @gcn3_kernel(%arg0: i32, %arg1: memref<1x16x16xbf16, #tpu.memory_space<vmem>>, %arg2: memref<1x16x8xbf16, #tpu.memory_space<vmem>>, %arg3: memref<8x128xbf16, #tpu.memory_space<vmem>>, %arg4: memref<1x128xf32, #tpu.memory_space<vmem>>, %arg5: memref<128x128xbf16, #tpu.memory_space<vmem>>, %arg6: memref<1x128xf32, #tpu.memory_space<vmem>>, %arg7: memref<128x128xbf16, #tpu.memory_space<vmem>>, %arg8: memref<1x128xf32, #tpu.memory_space<vmem>>, %arg9: memref<128x1xbf16, #tpu.memory_space<vmem>>, %arg10: memref<1x1xf32, #tpu.memory_space<vmem>>, %arg11: memref<1x1x1xf32, #tpu.memory_space<vmem>>) attributes {dimension_semantics = [#tpu.dimension_semantics<parallel>], iteration_bounds = array<i64: 8>, scalar_prefetch = 0 : i64, scratch_operands = 0 : i64, tpu.core_type = #tpu.core_type<tc>, window_params = [{transform_indices = @transform_0, window_bounds = array<i64: 1, 16, 16>}, {transform_indices = @transform_1, window_bounds = array<i64: 1, 16, 8>}, {pipeline_mode = #tpu.pipeline_mode<synchronous>, transform_indices = @transform_2, window_bounds = array<i64: 8, 128>}, {pipeline_mode = #tpu.pipeline_mode<synchronous>, transform_indices = @transform_3, window_bounds = array<i64: 1, 128>}, {pipeline_mode = #tpu.pipeline_mode<synchronous>, transform_indices = @transform_4, window_bounds = array<i64: 128, 128>}, {pipeline_mode = #tpu.pipeline_mode<synchronous>, transform_indices = @transform_5, window_bounds = array<i64: 1, 128>}, {pipeline_mode = #tpu.pipeline_mode<synchronous>, transform_indices = @transform_6, window_bounds = array<i64: 128, 128>}, {pipeline_mode = #tpu.pipeline_mode<synchronous>, transform_indices = @transform_7, window_bounds = array<i64: 1, 128>}, {pipeline_mode = #tpu.pipeline_mode<synchronous>, transform_indices = @transform_8, window_bounds = array<i64: 128, 1>}, {pipeline_mode = #tpu.pipeline_mode<synchronous>, transform_indices = @transform_9, window_bounds = array<i64: 1, 1>}, {transform_indices = @transform_10, window_bounds = array<i64: 1, 1, 1>}]} {
    %c0 = arith.constant 0 : index
    %c0_0 = arith.constant 0 : index
    %c0_1 = arith.constant 0 : index
    %0 = vector.load %arg1[%c0, %c0_0, %c0_1] : memref<1x16x16xbf16, #tpu.memory_space<vmem>>, vector<1x16x16xbf16>
    %1 = vector.shape_cast %0 : vector<1x16x16xbf16> to vector<16x16xbf16>
    %2 = arith.extf %1 : vector<16x16xbf16> to vector<16x16xf32>
    %cst = arith.constant dense<0.000000e+00> : vector<16xf32>
    %3 = vector.multi_reduction <add>, %2, %cst [1] : vector<16x16xf32> to vector<16xf32>
    %4 = vector.shape_cast %3 : vector<16xf32> to vector<16x1xf32>
    %cst_2 = arith.constant 1.000000e+00 : f32
    %5 = vector.broadcast %cst_2 : f32 to vector<16x1xf32>
    %6 = arith.maximumf %4, %5 : vector<16x1xf32>
    %cst_3 = arith.constant dense<0.000000e+00> : vector<16xf32>
    %7 = vector.multi_reduction <add>, %2, %cst_3 [0] : vector<16x16xf32> to vector<16xf32>
    %8 = vector.shape_cast %7 : vector<16xf32> to vector<1x16xf32>
    %cst_4 = arith.constant 1.000000e+00 : f32
    %9 = vector.broadcast %cst_4 : f32 to vector<1x16xf32>
    %10 = arith.maximumf %8, %9 : vector<1x16xf32>
    %11 = math.rsqrt %6 : vector<16x1xf32>
    %12 = vector.broadcast %11 : vector<16x1xf32> to vector<16x16xf32>
    %13 = arith.mulf %2, %12 : vector<16x16xf32>
    %14 = math.rsqrt %10 : vector<1x16xf32>
    %15 = vector.broadcast %14 : vector<1x16xf32> to vector<16x16xf32>
    %16 = arith.mulf %13, %15 : vector<16x16xf32>
    %17 = arith.truncf %16 : vector<16x16xf32> to vector<16x16xbf16>
    %c0_5 = arith.constant 0 : index
    %c0_6 = arith.constant 0 : index
    %c0_7 = arith.constant 0 : index
    %18 = vector.load %arg2[%c0_5, %c0_6, %c0_7] : memref<1x16x8xbf16, #tpu.memory_space<vmem>>, vector<1x16x8xbf16>
    %19 = vector.shape_cast %18 : vector<1x16x8xbf16> to vector<16x8xbf16>
    %c0_8 = arith.constant 0 : index
    %c0_9 = arith.constant 0 : index
    %20 = vector.load %arg3[%c0_8, %c0_9] : memref<8x128xbf16, #tpu.memory_space<vmem>>, vector<8x128xbf16>
    %cst_10 = arith.constant dense<0.000000e+00> : vector<16x128xf32>
    %21 = tpu.matmul %19, %20, %cst_10 {dimension_numbers = #tpu.dot_dimension_numbers<[1], [0], [0], [1], [0, 0, 1, 1], [], []>} : vector<16x8xbf16>, vector<8x128xbf16>, vector<16x128xf32> -> vector<16x128xf32>
    %22 = arith.truncf %21 : vector<16x128xf32> to vector<16x128xbf16>
    %cst_11 = arith.constant dense<0.000000e+00> : vector<16x128xf32>
    %23 = tpu.matmul %17, %22, %cst_11 {dimension_numbers = #tpu.dot_dimension_numbers<[1], [0], [0], [1], [0, 0, 1, 1], [], []>} : vector<16x16xbf16>, vector<16x128xbf16>, vector<16x128xf32> -> vector<16x128xf32>
    %c0_12 = arith.constant 0 : index
    %c0_13 = arith.constant 0 : index
    %24 = vector.load %arg4[%c0_12, %c0_13] : memref<1x128xf32, #tpu.memory_space<vmem>>, vector<1x128xf32>
    %25 = vector.broadcast %24 : vector<1x128xf32> to vector<16x128xf32>
    %26 = arith.addf %23, %25 : vector<16x128xf32>
    %cst_14 = arith.constant 0.000000e+00 : f32
    %27 = vector.broadcast %cst_14 : f32 to vector<16x128xf32>
    %28 = arith.maximumf %26, %27 : vector<16x128xf32>
    %29 = arith.truncf %28 : vector<16x128xf32> to vector<16x128xbf16>
    %c0_15 = arith.constant 0 : index
    %c0_16 = arith.constant 0 : index
    %30 = vector.load %arg5[%c0_15, %c0_16] : memref<128x128xbf16, #tpu.memory_space<vmem>>, vector<128x128xbf16>
    %cst_17 = arith.constant dense<0.000000e+00> : vector<16x128xf32>
    %31 = tpu.matmul %29, %30, %cst_17 {dimension_numbers = #tpu.dot_dimension_numbers<[1], [0], [0], [1], [0, 0, 1, 1], [], []>} : vector<16x128xbf16>, vector<128x128xbf16>, vector<16x128xf32> -> vector<16x128xf32>
    %32 = arith.truncf %31 : vector<16x128xf32> to vector<16x128xbf16>
    %cst_18 = arith.constant dense<0.000000e+00> : vector<16x128xf32>
    %33 = tpu.matmul %17, %32, %cst_18 {dimension_numbers = #tpu.dot_dimension_numbers<[1], [0], [0], [1], [0, 0, 1, 1], [], []>} : vector<16x16xbf16>, vector<16x128xbf16>, vector<16x128xf32> -> vector<16x128xf32>
    %c0_19 = arith.constant 0 : index
    %c0_20 = arith.constant 0 : index
    %34 = vector.load %arg6[%c0_19, %c0_20] : memref<1x128xf32, #tpu.memory_space<vmem>>, vector<1x128xf32>
    %35 = vector.broadcast %34 : vector<1x128xf32> to vector<16x128xf32>
    %36 = arith.addf %33, %35 : vector<16x128xf32>
    %cst_21 = arith.constant 0.000000e+00 : f32
    %37 = vector.broadcast %cst_21 : f32 to vector<16x128xf32>
    %38 = arith.maximumf %36, %37 : vector<16x128xf32>
    %39 = arith.truncf %38 : vector<16x128xf32> to vector<16x128xbf16>
    %c0_22 = arith.constant 0 : index
    %c0_23 = arith.constant 0 : index
    %40 = vector.load %arg7[%c0_22, %c0_23] : memref<128x128xbf16, #tpu.memory_space<vmem>>, vector<128x128xbf16>
    %cst_24 = arith.constant dense<0.000000e+00> : vector<16x128xf32>
    %41 = tpu.matmul %39, %40, %cst_24 {dimension_numbers = #tpu.dot_dimension_numbers<[1], [0], [0], [1], [0, 0, 1, 1], [], []>} : vector<16x128xbf16>, vector<128x128xbf16>, vector<16x128xf32> -> vector<16x128xf32>
    %42 = arith.truncf %41 : vector<16x128xf32> to vector<16x128xbf16>
    %cst_25 = arith.constant dense<0.000000e+00> : vector<16x128xf32>
    %43 = tpu.matmul %17, %42, %cst_25 {dimension_numbers = #tpu.dot_dimension_numbers<[1], [0], [0], [1], [0, 0, 1, 1], [], []>} : vector<16x16xbf16>, vector<16x128xbf16>, vector<16x128xf32> -> vector<16x128xf32>
    %c0_26 = arith.constant 0 : index
    %c0_27 = arith.constant 0 : index
    %44 = vector.load %arg8[%c0_26, %c0_27] : memref<1x128xf32, #tpu.memory_space<vmem>>, vector<1x128xf32>
    %45 = vector.broadcast %44 : vector<1x128xf32> to vector<16x128xf32>
    %46 = arith.addf %43, %45 : vector<16x128xf32>
    %cst_28 = arith.constant 0.000000e+00 : f32
    %47 = vector.broadcast %cst_28 : f32 to vector<16x128xf32>
    %48 = arith.maximumf %46, %47 : vector<16x128xf32>
    %49 = arith.truncf %48 : vector<16x128xf32> to vector<16x128xbf16>
    %cst_29 = arith.constant 6.250000e-02 : bf16
    %50 = vector.broadcast %cst_29 : bf16 to vector<1x16xbf16>
    %cst_30 = arith.constant dense<0.000000e+00> : vector<1x128xf32>
    %51 = tpu.matmul %50, %49, %cst_30 {dimension_numbers = #tpu.dot_dimension_numbers<[1], [0], [0], [1], [0, 0, 1, 1], [], []>} : vector<1x16xbf16>, vector<16x128xbf16>, vector<1x128xf32> -> vector<1x128xf32>
    %52 = arith.truncf %51 : vector<1x128xf32> to vector<1x128xbf16>
    %c0_31 = arith.constant 0 : index
    %c0_32 = arith.constant 0 : index
    %53 = vector.load %arg9[%c0_31, %c0_32] : memref<128x1xbf16, #tpu.memory_space<vmem>>, vector<128x1xbf16>
    %cst_33 = arith.constant dense<0.000000e+00> : vector<1x1xf32>
    %54 = tpu.matmul %52, %53, %cst_33 {dimension_numbers = #tpu.dot_dimension_numbers<[1], [0], [0], [1], [0, 0, 1, 1], [], []>} : vector<1x128xbf16>, vector<128x1xbf16>, vector<1x1xf32> -> vector<1x1xf32>
    %c0_34 = arith.constant 0 : index
    %c0_35 = arith.constant 0 : index
    %55 = vector.load %arg10[%c0_34, %c0_35] : memref<1x1xf32, #tpu.memory_space<vmem>>, vector<1x1xf32>
    %56 = arith.addf %54, %55 : vector<1x1xf32>
    %57 = arith.negf %56 : vector<1x1xf32>
    %58 = math.exp %57 : vector<1x1xf32>
    %cst_36 = arith.constant 1.000000e+00 : f32
    %59 = vector.broadcast %cst_36 : f32 to vector<1x1xf32>
    %60 = arith.addf %59, %58 : vector<1x1xf32>
    %61 = arith.divf %59, %60 : vector<1x1xf32>
    %c0_37 = arith.constant 0 : index
    %c0_38 = arith.constant 0 : index
    %c0_39 = arith.constant 0 : index
    %62 = vector.load %arg11[%c0_37, %c0_38, %c0_39] : memref<1x1x1xf32, #tpu.memory_space<vmem>>, vector<1x1x1xf32>
    %63 = vector.shape_cast %62 : vector<1x1x1xf32> to vector<1x1xf32>
    %64 = vector.shape_cast %61 : vector<1x1xf32> to vector<1x1x1xf32>
    tpu.vector_store %arg11[%c0_37, %c0_38, %c0_39], %64 {strides = array<i32>} : memref<1x1x1xf32, #tpu.memory_space<vmem>>, vector<1x1x1xf32>,
    return
  }
  func.func @transform_0(%arg0: i32) -> (i32, i32, i32) {
    %c0_i32 = arith.constant 0 : i32
    %c0_i32_0 = arith.constant 0 : i32
    %c0_i32_1 = arith.constant 0 : i32
    return %arg0, %c0_i32, %c0_i32_0 : i32, i32, i32
  }
  func.func @transform_1(%arg0: i32) -> (i32, i32, i32) {
    %c0_i32 = arith.constant 0 : i32
    %c0_i32_0 = arith.constant 0 : i32
    %c0_i32_1 = arith.constant 0 : i32
    return %arg0, %c0_i32, %c0_i32_0 : i32, i32, i32
  }
  func.func @transform_2(%arg0: i32) -> (i32, i32) {
    %c0_i32 = arith.constant 0 : i32
    %c0_i32_0 = arith.constant 0 : i32
    %c0_i32_1 = arith.constant 0 : i32
    return %c0_i32, %c0_i32_0 : i32, i32
  }
  func.func @transform_3(%arg0: i32) -> (i32, i32) {
    %c0_i32 = arith.constant 0 : i32
    %c0_i32_0 = arith.constant 0 : i32
    %c0_i32_1 = arith.constant 0 : i32
    return %c0_i32, %c0_i32_0 : i32, i32
  }
  func.func @transform_4(%arg0: i32) -> (i32, i32) {
    %c0_i32 = arith.constant 0 : i32
    %c0_i32_0 = arith.constant 0 : i32
    %c0_i32_1 = arith.constant 0 : i32
    return %c0_i32, %c0_i32_0 : i32, i32
  }
  func.func @transform_5(%arg0: i32) -> (i32, i32) {
    %c0_i32 = arith.constant 0 : i32
    %c0_i32_0 = arith.constant 0 : i32
    %c0_i32_1 = arith.constant 0 : i32
    return %c0_i32, %c0_i32_0 : i32, i32
  }
  func.func @transform_6(%arg0: i32) -> (i32, i32) {
    %c0_i32 = arith.constant 0 : i32
    %c0_i32_0 = arith.constant 0 : i32
    %c0_i32_1 = arith.constant 0 : i32
    return %c0_i32, %c0_i32_0 : i32, i32
  }
  func.func @transform_7(%arg0: i32) -> (i32, i32) {
    %c0_i32 = arith.constant 0 : i32
    %c0_i32_0 = arith.constant 0 : i32
    %c0_i32_1 = arith.constant 0 : i32
    return %c0_i32, %c0_i32_0 : i32, i32
  }
  func.func @transform_8(%arg0: i32) -> (i32, i32) {
    %c0_i32 = arith.constant 0 : i32
    %c0_i32_0 = arith.constant 0 : i32
    %c0_i32_1 = arith.constant 0 : i32
    return %c0_i32, %c0_i32_0 : i32, i32
  }
  func.func @transform_9(%arg0: i32) -> (i32, i32) {
    %c0_i32 = arith.constant 0 : i32
    %c0_i32_0 = arith.constant 0 : i32
    %c0_i32_1 = arith.constant 0 : i32
    return %c0_i32, %c0_i32_0 : i32, i32
  }
  func.func @transform_10(%arg0: i32) -> (i32, i32, i32) {
    %c0_i32 = arith.constant 0 : i32
    %c0_i32_0 = arith.constant 0 : i32
    %c0_i32_1 = arith.constant 0 : i32
    return %arg0, %c0_i32, %c0_i32_0 : i32, i32, i32
  }
}

</mosaic_0001>

<bundles_post_ra>
// kernel: tpu_custom_call.1
= control target key start
LH: loop header
LB: loop body
LE: loop exit
PB: predicated region body
PF: predicated region fallthrough
CT: control target
= control target key end

     0   :  { %s1600_s0 = inlined_call_operand.vmem [shape: bf16[8,16,16], index: 0, kind: input, shape index: {}]   ;;  %s1601_s1 = inlined_call_operand.vmem [shape: bf16[8,16,8], index: 1, kind: input, shape index: {}]   ;;  %s1602_s2 = inlined_call_operand.vmem [shape: bf16[8,128], index: 2, kind: input, shape index: {}]   ;;  %s1603_s3 = inlined_call_operand.vmem [shape: f32[1,128], index: 3, kind: input, shape index: {}]   ;;  %s1604_s4 = inlined_call_operand.vmem [shape: bf16[128,128], index: 4, kind: input, shape index: {}]   ;;  %s1605_s5 = inlined_call_operand.vmem [shape: f32[1,128], index: 5, kind: input, shape index: {}]   ;;  %s1606_s6 = inlined_call_operand.hbm [shape: bf16[128,128], index: 6, kind: input, shape index: {}]   ;;  %s1607_s7 = inlined_call_operand.vmem [shape: f32[1,128], index: 7, kind: input, shape index: {}]   ;;  %s1608_s8 = inlined_call_operand.vmem [shape: bf16[128,1], index: 8, kind: input, shape index: {}]   ;;  %s1609_s9 = inlined_call_operand.<no memory space> [shape: f32[1,1], index: 9, kind: input, shape index: {}]   ;;  %s1610_s10 = inlined_call_operand.vmem [shape: f32[8,1,1], index: 10, kind: output, shape index: {}]  }
   0x1   :  { %v15_v0 = vstv %s1609_s9 }
   0x2   :  { %16 = vst [vmem:[#allocation2] sm:$0x1] %v15_v0 }
   0x3   :  { %17 = vsyncpa [#allocation4], 0  ;;  %s1421_s15 = smov 0  }
   0x4 LB: > { %s1427_s16 = sadd.s32 4294967295, %s1355_s15   ;;  %p1080_p0 = scmp.ge.s32.totalorder %s1355_s15, 1  ;;  %s1355_s15 = sphi %s1421_s15, %s23_s15  }
   0x5   : > { %p274_p1 = scmp.lt.s32.totalorder %s1355_s15, 9  ;;  %s1357_s17 = smov [#allocation3]  }
   0x6   : > { %s298_s9 = sshll.u32 %s1357_s17, 4  ;;  %p1611_p3 = scmp.eq.s32.totalorder %s1427_s16, 0  ;;  %s299_s9 = int_to_ptr.vmem [resolvable:$true] %s298_s9 }
   0x7   : > { %p1431_p2 = pnand %p1080_p0, %p274_p1  ;;  %s1317_s22 = scalar_lea.hbm %s1606_s6, 1024 }
   0x8   : > { %p1318_p6 = scmp.ne.s32.totalorder %s1606_s6, %s1317_s22  ;;  %p1324_p10 = scmp.lt.u32.totalorder %s1317_s22, %s1606_s6 }
   0x9   : > { %s1613_s18 = scalar_select %p1431_p2, 1, 0 }
   0xa   : > { %p1262_p4 = pneg %p1431_p2 }
   0xc   : > { %p1440_p5 = pnand %p1611_p3, %p1262_p4 }
   0xe   : > { %p1319_p7 = pneg %p1440_p5 }
  0x10   : > { %p1320_p8 = pnand %p1319_p7, %p1318_p6 }
  0x12   : > { %p1321_p9 = pneg %p1320_p8 }
  0x14   : > { %p1326_p11 = pnand %p1324_p10, %p1321_p9 }
  0x16   : > { %1329 = shalt.err (!%p1326_p11)
}
  0x17   : > { %s1330_s27 = scalar_lea.vmem %s299_s9, 1024  ;;  %p1338_p1 = scmp.lt.s32.totalorder %s299_s9, %s299_s9 }
  0x18   : > { %p1331_p12 = scmp.ne.s32.totalorder %s299_s9, %s1330_s27  ;;  %p1339_p4 = scmp.lt.s32.totalorder %s1330_s27, %s1330_s27 }
  0x1a   : > { %p1333_p13 = pnand %p1331_p12, %p1319_p7  ;;  %p1340_p3 = por %p1339_p4, %p1338_p1 }
  0x1c   : > { %p1334_p0 = pneg %p1333_p13 }
  0x1e   : > { %p1341_p2 = pnand %p1340_p3, %p1334_p0 }
  0x20   : > { %1344 = shalt.err (!%p1341_p2)
}
  0x21   : > { %s1358_s28 = smov 64   ;;  %s1359_s29 = smov 4  }
  0x22   : > { %1265 = dma.hbm_to_vmem [thread:$0]  (!%p1440_p5), %s1606_s6, 1024, %s299_s9, [#allocation4], %s1358_s28, %s1358_s28, %s1359_s29  }
  0x23   : > { %p1615_p6 = scmp.ne.s32.totalorder %s1613_s18, 0 }
  0x24   : > { %p1616_p8 = scmp.eq.s32.totalorder (!%p1615_p6), %s1427_s16, 0 }
  0x25   : > { %339 = sbr.rel (%p1615_p6) target bundleno = 1826 (0x722), region = 60 }
  0x2c   : > { %1350 = dma.done.wait (%p1616_p8), [#allocation4], 1024   ;;  %p1617_p7 = pmov %p1616_p8 }
  0x2d   : > { %p380_p2 = scmp.lt.s32.totalorder %s1427_s16, 7  ;;  %v1360_v1 = vmov 0.0   ;;  %vm1361_vm0 = vmmov 0   ;;  %vm436_vm1 = vcmask 1043456   ;;  %vm432_vm2 = vcmask 64512   ;;  %v1283_v34 = vld [vmem:[%s1604_s4] sm:$0xff]  }
  0x2e   : > { %1352 = vsyncadd (%p1617_p7), [#allocation4], 4294966272  ;;  %1168 = vmatprep.subr.bf16.mxu0 %v1360_v1  ;;  %1170 = vmatprep.mubr.msk.bf16.mxu0 %vm1361_vm0, %v1360_v1  ;;  %v426_v2 = vld [vmem:[%s1602_s2] sm:$0xf]  ;;  %vm399_vm3 = vcmask 130048   ;;  %v1284_v36 = vld [vmem:[%s1604_s4 + $0x8] sm:$0xff]  }
  0x2f   : > { %s1619_s16 = smov (!%p380_p2, %s1427_s16), 7  ;;  %1200 = vmatprep.subr.bf16.mxu1 %v1360_v1  ;;  %1202 = vmatprep.mubr.msk.bf16.mxu1 %vm1361_vm0, %v1360_v1  ;;  %v438_v3 = vsel %vm436_vm1, %v426_v2, 0  ;;  %v1285_v37 = vld [vmem:[%s1604_s4 + $0x10] sm:$0xff]   ;;  %v1286_v38 = vld [vmem:[%s1604_s4 + $0x18] sm:$0xff]   ;;  %v1287_v39 = vld [vmem:[%s1604_s4 + $0x20] sm:$0xff]   ;;  %vm1005_vm4 = vcmask 0  }
  0x30   : > { %s1125_s12 = sshll.u32 %s1619_s16, 3  ;;  %1169 = vmatpush3.bf16.msra.mxu0 %v438_v3  ;;  %v1288_v40 = vld [vmem:[%s1604_s4 + $0x28] sm:$0xff]   ;;  %v1289_v41 = vld [vmem:[%s1604_s4 + $0x30] sm:$0xff]   ;;  %v1290_v42 = vld [vmem:[%s1604_s4 + $0x38] sm:$0xff]   ;;  %s392_s24 = scalar_lea.vmem %s1610_s10, %s1619_s16 }
  0x31   : > { %s389_s17 = scalar_lea.vmem %s1601_s1, %s1125_s12  ;;  %s384_s19 = scalar_lea.vmem %s1600_s0, %s1125_s12  ;;  %1174 = vmatprep.subr.bf16.mxu0 %v1360_v1  ;;  %v1091_v43 = vld [vmem:[%s1603_s3] ss:$0 sm:$0xff]  ;;  %v1291_v58 = vld [vmem:[#allocation3] sm:$0xff]   ;;  %v1292_v59 = vld [vmem:[#allocation3 + $0x8] sm:$0xff]  }
  0x32   : > { %v1282_v4 = vld [vmem:[%s389_s17] sm:$0xff]   ;;  %v1293_v60 = vld [vmem:[#allocation3 + $0x10] sm:$0xff]   ;;  %v1296_v63 = vld [vmem:[#allocation3 + $0x28] sm:$0xff]  }
  0x33   : > { %v1128_v5 = vld [vmem:[%s384_s19] sm:$0xff]   ;;  %1171 = vmatmul.mubr.msk.bf16.vlgmr.msra.gmra.mrb[0].mxu0 %vm432_vm2, %v1282_v4  ;;  %v1297_v0 = vld [vmem:[#allocation3 + $0x30] sm:$0xff]  }
  0x34   : > { %v1129_v6 = vunpack.c.l.bf16 %v1128_v5  ;;  %v1130_v7 = vunpack.c.h.bf16 %v1128_v5  ;;  %1176 = vmatprep.mubr.msk.bf16.mxu0 %vm1361_vm0, %v1360_v1  ;;  %v1294_v61 = vld [vmem:[#allocation3 + $0x18] sm:$0xff]   ;;  %v1295_v62 = vld [vmem:[#allocation3 + $0x20] sm:$0xff]  }
  0x35   : > { %v1298_v2 = vld [vmem:[#allocation3 + $0x38] sm:$0xff]  }
  0x36   : > { %v400_v8 = vsel %vm399_vm3, %v1129_v6, 0.0  ;;  %v403_v9 = vsel %vm399_vm3, %v1130_v7, 0.0  ;;  %v1101_v3 = vld [vmem:[%s1605_s5] ss:$0 sm:$0xff] }
  0x37   : > { %401 = vadd.xlane.f32.xlu0 %v400_v8  ;;  %v408_v10 = vadd.f32 %v403_v9, %v400_v8 }
  0x39   : > { %v409_v11 = vrot.slane %v408_v10, 4 }
  0x3b   : > { %404 = vadd.xlane.f32.xlu0 %v403_v9  ;;  %v410_v12 = vadd.f32 %v409_v11, %v408_v10 }
  0x3d   : > { %v411_v13 = vrot.slane %v410_v12, 2 }
  0x3f   : > { %v412_v15 = vadd.f32 %v411_v13, %v410_v12 }
  0x41   : > { %v413_v16 = vrot.slane %v412_v15, 1 }
  0x43   : > { %v414_v19 = vadd.f32 %v413_v16, %v412_v15 }
  0x45   : > { %v415_v21 = vmax.f32 %v414_v19, 1.0  ;;  %v1300_v19 = vld [vmem:[%s1608_s8 + $0x8] sm:$0xff]  }
  0xc4   : > { %v402_v14 = vpop.xlane.xlu0 %401 }
  0xc5   : > { %v406_v18 = vmax.f32 %v402_v14, 1.0 }
  0xc7   : > { %1307 = vrsqrt.f32 %v406_v18  ;;  %v1299_v18 = vld [vmem:[%s1608_s8] sm:$0xff]  }
  0xc8   : > { %v405_v17 = vpop.xlane.xlu0 %404 }
  0xc9   : > { %v407_v20 = vmax.f32 %v405_v17, 1.0 }
  0xcb   : > { %1309 = vrsqrt.f32 %v407_v20  ;;  %v1301_v20 = vld [vmem:[%s1608_s8 + $0x10] sm:$0xff]  }
  0xcc   : > { %1311 = vrsqrt.f32 %v415_v21  ;;  %v1302_v21 = vld [vmem:[%s1608_s8 + $0x18] sm:$0xff]  }
  0xd1   : > { %v1308_v22 = vpop.eup %1307 }
  0xd2   : > { %v418_v24 = vmul.f32 %v1308_v22, %v1129_v6  ;;  %v1303_v22 = vld [vmem:[%s1608_s8 + $0x20] sm:$0xff]  }
  0xd5   : > { %v1310_v23 = vpop.eup %1309 }
  0xd6   : > { %v419_v25 = vmul.f32 %v1310_v23, %v1130_v7  ;;  %v1312_v26 = vpop.eup %1311  ;;  %v1304_v23 = vld [vmem:[%s1608_s8 + $0x28] sm:$0xff]  }
  0xd7   : > { %v421_v31 = vmul.f32 %v1312_v26, %v418_v24  ;;  %v1305_v24 = vld [vmem:[%s1608_s8 + $0x30] sm:$0xff]  }
  0xd8   : > { %v422_v29 = vmul.f32 %v1312_v26, %v419_v25  ;;  %v1111_v25 = vld [vmem:[%s1607_s7] ss:$0 sm:$0xff] }
  0xda   : > { %v1494_v35 = vpack.c.bf16 %v422_v29, %v421_v31 }
 0x106   : > { %v474_v27 = vpop.f32.mrb[0].mxu0 }
 0x107   : > { %v1172_v28 = vpop.f32.mrb[1].mxu0 }
 0x108   : > { %v477_v30 = vpop.f32.mrb[2].mxu0 }
 0x109   : > { %v481_v32 = vpack.c.bf16 %v477_v30, %v474_v27  ;;  %v1173_v33 = vpop.f32.mrb[3].mxu0 }
 0x10b   : > { %1175 = vmatpush3.bf16.msra.mxu0 %v481_v32 }
 0x10c   : > { %1180 = vmatprep.subr.bf16.mxu0 %v1360_v1 }
 0x10e   : > { %1177 = vmatmul.mubr.msk.bf16.vlgmr.msra.gmra.mrb[4].mxu0 %vm399_vm3, %v1494_v35 }
 0x10f   : > { %1181 = vmatpush3.bf16.msra.mxu0 %v1283_v34  ;;  %1196 = vmatprep.mubr.msk.bf16.mxu0 %vm1361_vm0, %v1360_v1 }
 0x110   : > { %1182 = vmatprep.subr.bf16.mxu0 %v1360_v1 }
 0x113   : > { %1183 = vmatpush3.bf16.msra.mxu0 %v1284_v36 }
 0x114   : > { %1184 = vmatprep.subr.bf16.mxu0 %v1360_v1 }
 0x117   : > { %1185 = vmatpush3.bf16.msra.mxu0 %v1285_v37 }
 0x118   : > { %1186 = vmatprep.subr.bf16.mxu0 %v1360_v1 }
 0x11b   : > { %1187 = vmatpush3.bf16.msra.mxu0 %v1286_v38 }
 0x11c   : > { %1188 = vmatprep.subr.bf16.mxu0 %v1360_v1 }
 0x11f   : > { %1189 = vmatpush3.bf16.msra.mxu0 %v1287_v39 }
 0x120   : > { %1190 = vmatprep.subr.bf16.mxu0 %v1360_v1 }
 0x123   : > { %1191 = vmatpush3.bf16.msra.mxu0 %v1288_v40 }
 0x124   : > { %1192 = vmatprep.subr.bf16.mxu0 %v1360_v1 }
 0x127   : > { %1193 = vmatpush3.bf16.msra.mxu0 %v1289_v41  ;;  %v910_v41 = vld [vmem:[#allocation2] sm:$0x1] }
 0x128   : > { %1194 = vmatprep.subr.bf16.mxu0 %v1360_v1 }
 0x12b   : > { %1195 = vmatpush3.bf16.msra.mxu0 %v1290_v42 }
 0x12c   : > { %1226 = vmatprep.subr.bf16.mxu0 %v1360_v1 }
 0x1e1   : > { %v526_v44 = vpop.f32.mrb[4].mxu0 }
 0x1e2   : > { %v527_v45 = vadd.f32 %v1091_v43, %v526_v44  ;;  %v1178_v46 = vpop.f32.mrb[5].mxu0 }
 0x1e3   : > { %v529_v47 = vpop.f32.mrb[6].mxu0 }
 0x1e4   : > { %v530_v48 = vadd.f32 %v1091_v43, %v529_v47  ;;  %v1179_v49 = vpop.f32.mrb[7].mxu0  ;;  %v533_v50 = vmax.f32 %v527_v45, 0.0 }
 0x1e6   : > { %v534_v51 = vmax.f32 %v530_v48, 0.0 }
 0x1e8   : > { %v535_v52 = vpack.c.bf16 %v534_v51, %v533_v50 }
 0x1ea   : > { %1197 = vmatmul.mubr.bf16.vlgmr.msra.gmra.mrb[8].mxu0 %v535_v52 }
 0x1eb   : > { %1228 = vmatprep.mubr.msk.bf16.mxu0 %vm1361_vm0, %v1360_v1 }
 0x2bd   : > { %v634_v53 = vpop.f32.mrb[8].mxu0 }
 0x2be   : > { %v1198_v54 = vpop.f32.mrb[9].mxu0 }
 0x2bf   : > { %v637_v55 = vpop.f32.mrb[10].mxu0 }
 0x2c0   : > { %v641_v56 = vpack.c.bf16 %v637_v55, %v634_v53  ;;  %v1199_v57 = vpop.f32.mrb[11].mxu0 }
 0x2c2   : > { %1201 = vmatpush3.bf16.msra.mxu1 %v641_v56 }
 0x2c3   : > { %1206 = vmatprep.subr.bf16.mxu1 %v1360_v1 }
 0x2c5   : > { %1203 = vmatmul.mubr.msk.bf16.vlgmr.msra.gmra.mrb[0].mxu1 %vm399_vm3, %v1494_v35 }
 0x2c6   : > { %1207 = vmatpush3.bf16.msra.mxu1 %v1291_v58  ;;  %1222 = vmatprep.mubr.msk.bf16.mxu1 %vm1361_vm0, %v1360_v1 }
 0x2c7   : > { %1208 = vmatprep.subr.bf16.mxu1 %v1360_v1 }
 0x2ca   : > { %1209 = vmatpush3.bf16.msra.mxu1 %v1292_v59 }
 0x2cb   : > { %1210 = vmatprep.subr.bf16.mxu1 %v1360_v1 }
 0x2ce   : > { %1211 = vmatpush3.bf16.msra.mxu1 %v1293_v60 }
 0x2cf   : > { %1212 = vmatprep.subr.bf16.mxu1 %v1360_v1 }
 0x2d2   : > { %1213 = vmatpush3.bf16.msra.mxu1 %v1294_v61 }
 0x2d3   : > { %1214 = vmatprep.subr.bf16.mxu1 %v1360_v1 }
 0x2d6   : > { %1215 = vmatpush3.bf16.msra.mxu1 %v1295_v62 }
 0x2d7   : > { %1216 = vmatprep.subr.bf16.mxu1 %v1360_v1 }
 0x2da   : > { %1217 = vmatpush3.bf16.msra.mxu1 %v1296_v63 }
 0x2db   : > { %1218 = vmatprep.subr.bf16.mxu1 %v1360_v1 }
 0x2de   : > { %1219 = vmatpush3.bf16.msra.mxu1 %v1297_v0 }
 0x2df   : > { %1220 = vmatprep.subr.bf16.mxu1 %v1360_v1 }
 0x2e2   : > { %1221 = vmatpush3.bf16.msra.mxu1 %v1298_v2 }
 0x2e3   : > { %1238 = vmatprep.subr.bf16.mxu1 %v1360_v1 }
 0x398   : > { %v683_v4 = vpop.f32.mrb[0].mxu1 }
 0x399   : > { %v684_v5 = vadd.f32 %v1101_v3, %v683_v4  ;;  %v1204_v6 = vpop.f32.mrb[1].mxu1 }
 0x39a   : > { %v686_v7 = vpop.f32.mrb[2].mxu1 }
 0x39b   : > { %v687_v8 = vadd.f32 %v1101_v3, %v686_v7  ;;  %v1205_v9 = vpop.f32.mrb[3].mxu1  ;;  %v690_v10 = vmax.f32 %v684_v5, 0.0 }
 0x39d   : > { %v691_v11 = vmax.f32 %v687_v8, 0.0 }
 0x39f   : > { %v692_v12 = vpack.c.bf16 %v691_v11, %v690_v10 }
 0x3a1   : > { %1223 = vmatmul.mubr.bf16.vlgmr.msra.gmra.mrb[4].mxu1 %v692_v12 }
 0x3a2   : > { %1254 = vmatprep.mubr.msk.bf16.mxu1 %vm1361_vm0, %v1360_v1  ;;  %1239 = vmatpush3.bf16.msra.mxu1 %v1299_v18 }
 0x3a3   : > { %1240 = vmatprep.subr.bf16.mxu1 %v1360_v1 }
 0x3a6   : > { %1241 = vmatpush3.bf16.msra.mxu1 %v1300_v19 }
 0x3a7   : > { %1242 = vmatprep.subr.bf16.mxu1 %v1360_v1 }
 0x3aa   : > { %1243 = vmatpush3.bf16.msra.mxu1 %v1301_v20 }
 0x3ab   : > { %1244 = vmatprep.subr.bf16.mxu1 %v1360_v1 }
 0x3ae   : > { %1245 = vmatpush3.bf16.msra.mxu1 %v1302_v21 }
 0x3af   : > { %1246 = vmatprep.subr.bf16.mxu1 %v1360_v1 }
 0x3b2   : > { %1247 = vmatpush3.bf16.msra.mxu1 %v1303_v22 }
 0x3b3   : > { %1248 = vmatprep.subr.bf16.mxu1 %v1360_v1 }
 0x3b6   : > { %1249 = vmatpush3.bf16.msra.mxu1 %v1304_v23 }
 0x3b7   : > { %1250 = vmatprep.subr.bf16.mxu1 %v1360_v1 }
 0x3ba   : > { %1251 = vmatpush3.bf16.msra.mxu1 %v1305_v24 }
 0x3bb   : > { %1252 = vmatprep.subr.bf16.mxu1 %v1360_v1 }
 0x474   : > { %v791_v13 = vpop.f32.mrb[4].mxu1 }
 0x475   : > { %v1224_v14 = vpop.f32.mrb[5].mxu1 }
 0x476   : > { %v794_v15 = vpop.f32.mrb[6].mxu1 }
 0x477   : > { %v798_v16 = vpack.c.bf16 %v794_v15, %v791_v13  ;;  %v1225_v17 = vpop.f32.mrb[7].mxu1 }
 0x479   : > { %1227 = vmatpush3.bf16.msra.mxu0 %v798_v16 }
 0x47a   : > { %1232 = vmatprep.subr.bf16.mxu0 %v1360_v1 }
 0x47c   : > { %1229 = vmatmul.mubr.msk.bf16.vlgmr.msra.gmra.mrb[12].mxu0 %vm399_vm3, %v1494_v35  ;;  %v1362_v35 = vmov 1031814528  }
 0x47d   : > { %1234 = vmatprep.mubr.msk.bf16.mxu0 %vm1361_vm0, %v1360_v1  ;;  %v1306_v1 = vld [vmem:[%s1608_s8 + $0x38] sm:$0xff]  }
 0x47e   : > { %1253 = vmatpush3.bf16.msra.mxu1 %v1306_v1 }
 0x54f   : > { %v840_v26 = vpop.f32.mrb[12].mxu0 }
 0x550   : > { %v841_v27 = vadd.f32 %v1111_v25, %v840_v26  ;;  %v1230_v28 = vpop.f32.mrb[13].mxu0 }
 0x551   : > { %v843_v29 = vpop.f32.mrb[14].mxu0 }
 0x552   : > { %v844_v30 = vadd.f32 %v1111_v25, %v843_v29  ;;  %v1231_v31 = vpop.f32.mrb[15].mxu0  ;;  %v847_v32 = vmax.f32 %v841_v27, 0.0 }
 0x554   : > { %v848_v33 = vmax.f32 %v844_v30, 0.0 }
 0x556   : > { %v849_v34 = vpack.c.bf16 %v848_v33, %v847_v32 }
 0x558   : > { %1233 = vmatpush3.bf16.msra.mxu0 %v849_v34 }
 0x55b   : > { %1235 = vmatmul.mubr.msk.bf16.vlgmr.msra.gmra.mrb[16].mxu0 %vm399_vm3, %v1362_v35 }
 0x62e   : > { %v887_v36 = vpop.f32.mrb[16].mxu0 }
 0x62f   : > { %v893_v37 = vpack.c.bf16 %v887_v36, %v887_v36  ;;  %v1236_v38 = vpop.f32.mrb[17].mxu0 }
 0x630   : > { %v890_v39 = vpop.f32.mrb[18].mxu0 }
 0x631   : > { %v1237_v40 = vpop.f32.mrb[19].mxu0  ;;  %1255 = vmatmul.mubr.bf16.vlgmr.msra.gmra.mrb[8].mxu1 %v893_v37 }
 0x704   : > { %v993_v42 = vpop.f32.mrb[8].mxu1 }
 0x705   : > { %v994_v43 = vadd.f32 %v993_v42, %v910_v41  ;;  %v1256_v44 = vpop.f32.mrb[9].mxu1 }
 0x706   : > { %v996_v45 = vpop.f32.mrb[10].mxu1 }
 0x707   : > { %v1122_v46 = vmul.f32 -1.442695, %v994_v43  ;;  %v1257_v47 = vpop.f32.mrb[11].mxu1 }
 0x709   : > { %1313 = vpow2.f32 %v1122_v46 }
 0x713   : > { %v1314_v48 = vpop.eup %1313 }
 0x714   : > { %v1002_v49 = vadd.f32 1.0, %v1314_v48 }
 0x716   : > { %1315 = vrcp.f32 %v1002_v49 }
 0x720   : > { %v1316_v50 = vpop.eup %1315 }
 0x721   : > { %1006 = vst.msk [vmem:[%s392_s24] sm:$0x1] %vm1005_vm4, %v1316_v50 }
 0x722 PF: > { %s23_s15 = sadd.s32 1, %s1355_s15  }
 0x723   : > { %p20_p3 = scmp.ge.s32.totalorder %s23_s15, 10  }
 0x725   :  { %22 = sbr.rel (!%p20_p3) target bundleno = 4 (0x4), region = 98 }
 0x72c   :  { %1024 = vsyncpa [#allocation4], 1 }
 0x72d   :  { %1026 = vsyncpa [#allocation4 + $0x1], 1 }

</bundles_post_ra>
